<compile_context>
chip_gen: v6e
topology: v6e:2x2x1
jax: 0.10.0
libtpu: 0.0.40
codegen_flags: <defaults>
</compile_context>

<pallas_src>
import jax
import jax.numpy as jnp
from jax.experimental import pallas as pl
from jax.experimental.pallas import tpu as pltpu

K_IN = 4       # q_proj input features
N_OUT = 2      # out_proj output features
GROUP = 64     # original rows packed into one reshaped row
KB = K_IN * GROUP    # 256  lane width of input tiles
NB = N_OUT * GROUP   # 128  lane width of output tiles


def _round_up(a, b):
    return (a + b - 1) // b * b


def myblock_kernel(w_ref, b_ref, x_ref, o_ref):
    """One fused affine tile in natural (row-major) layout.

    w_ref: (256, 128) f32 VMEM  block-diagonal fused weight (Wq@Wo repeated 64x)
    b_ref: (1, 128)   f32 VMEM  fused bias tiled over the 64-row group
    x_ref: (TM, 256)  f32 VMEM  TM*64 original rows, channels interleaved
    o_ref: (TM, 128)  f32 VMEM  same rows, output channels interleaved
    """
    o_ref[...] = (
        jnp.dot(
            x_ref[...], w_ref[...],
            preferred_element_type=jnp.float32,
            precision=jax.lax.Precision.HIGHEST,   # f32-accurate MXU contraction
        )
        + b_ref[...]
    )


def myblock_forward(x, wq, bq, wo, bo, *, tm_rows_max=8192):
    """x: [B, S, 4] f32 -> [B, S, 2] f32  (== out_proj(q_proj(x)))."""
    B, S, d_in = x.shape
    assert d_in == K_IN
    M = B * S

    # ---- fuse the two linears into one affine map (math-identical) ----
    wf = (wq @ wo).astype(jnp.float32)        # (4, 2)
    bf = (bq @ wo + bo).astype(jnp.float32)   # (2,)

    # ---- block-diagonal expansion so the kernel works in the natural layout ----
    # w_big[4*m + k, 2*m + j] = wf[k, j]; zeros elsewhere.
    eye = jnp.eye(GROUP, dtype=jnp.float32)
    w_big = jnp.einsum("mn,kj->mknj", eye, wf).reshape(KB, NB)   # (256, 128)
    b_big = jnp.tile(bf, GROUP).reshape(1, NB)                   # (1, 128)

    # ---- tiling over packed rows (one packed row = GROUP original rows) ----
    m_rows = pl.cdiv(M, GROUP)
    tm_rows = min(tm_rows_max, _round_up(m_rows, 8))
    if m_rows > tm_rows:
        # multi-tile: keep >= 4 grid steps so the parallel grid can feed 2 TCs (v7x)
        tm_rows = max(8, min(tm_rows_max, _round_up(pl.cdiv(m_rows, 4), 8)))
    m_rows_pad = _round_up(m_rows, tm_rows)
    grid = (m_rows_pad // tm_rows,)

    # Bitcast-style reshape of the contiguous input: no transpose, no relayout.
    x_flat = x.reshape(M * K_IN)
    pad = m_rows_pad * KB - M * K_IN
    if pad:
        x_flat = jnp.pad(x_flat, (0, pad))
    x2d = x_flat.reshape(m_rows_pad, KB)

    out2d = pl.pallas_call(
        myblock_kernel,
        out_shape=jax.ShapeDtypeStruct((m_rows_pad, NB), jnp.float32),
        grid=grid,
        in_specs=[
            pl.BlockSpec((KB, NB), lambda i: (0, 0)),        # weight: resident
            pl.BlockSpec((1, NB), lambda i: (0, 0)),         # bias:   resident
            pl.BlockSpec((tm_rows, KB), lambda i: (i, 0)),   # x tile
        ],
        out_specs=pl.BlockSpec((tm_rows, NB), lambda i: (i, 0)),
        compiler_params=pltpu.CompilerParams(
            dimension_semantics=("parallel",),     # megacore / dual-TC sharding
            vmem_limit_bytes=32 * 1024 * 1024,     # ~24.3 MiB peak @ tm_rows=8192
        ),
    )(w_big, b_big, x2d)

    # Output is already in natural flat layout — trim the pad and restore [B, S, 2].
    # (Padded tail rows hold bias values only; they are sliced off here.)
    z = out2d.reshape(m_rows_pad * NB)[: M * N_OUT]
    return z.reshape(B, S, N_OUT)


if __name__ == "__main__":
    key = jax.random.PRNGKey(0)
    kx, k1, k2, k3, k4, kx2 = jax.random.split(key, 6)

    # Parameters stored as [in, out] (torch weight^T) + bias, deterministic.
    wq = jax.random.normal(k1, (4, 4), dtype=jnp.float32) * 0.5   # q_proj.weight^T
    bq = jax.random.normal(k2, (4,), dtype=jnp.float32) * 0.1     # q_proj.bias
    wo = jax.random.normal(k3, (4, 2), dtype=jnp.float32) * 0.5   # out_proj.weight^T
    bo = jax.random.normal(k4, (2,), dtype=jnp.float32) * 0.1     # out_proj.bias

    def ref(x):
        # Same math as the PyTorch module: two separate affine maps.
        return (x @ wq + bq) @ wo + bo

    fwd = jax.jit(myblock_forward, static_argnames=("tm_rows_max",))

    # Small demo shape implied by the module: batch=2, seq=8, features=4.
    B, S = 2, 8
    x = jax.random.normal(kx, (B, S, K_IN), dtype=jnp.float32)
    z = fwd(x, wq, bq, wo, bo)
    jax.block_until_ready(z)
    assert z.shape == (B, S, N_OUT)
    assert jnp.allclose(z, ref(x), atol=1e-5, rtol=1e-5)

    # Ragged / multi-tile path (review correctness concern): M not a multiple of
    # the 64-row group, tm_rows_max forced small so the grid has several steps.
    B2, S2 = 2, 300
    x2 = jax.random.normal(kx2, (B2, S2, K_IN), dtype=jnp.float32)
    z2 = fwd(x2, wq, bq, wo, bo, tm_rows_max=8)
    jax.block_until_ready(z2)
    assert z2.shape == (B2, S2, N_OUT)
    assert jnp.allclose(z2, ref(x2), atol=1e-5, rtol=1e-5)

    print("KERNEL_OK")
</pallas_src>

<mosaic_0001>
module attributes {stable_mosaic.version = 11 : i64} {
  func.func @myblock_kernel(%arg0: i32, %arg1: memref<256x128xf32, #tpu.memory_space<vmem>>, %arg2: memref<1x128xf32, #tpu.memory_space<vmem>>, %arg3: memref<8x256xf32, #tpu.memory_space<vmem>>, %arg4: memref<8x128xf32, #tpu.memory_space<vmem>>) attributes {dimension_semantics = [#tpu.dimension_semantics<parallel>], iteration_bounds = array<i64: 1>, scalar_prefetch = 0 : i64, scratch_operands = 0 : i64, tpu.core_type = #tpu.core_type<tc>, window_params = [{pipeline_mode = #tpu.pipeline_mode<synchronous>, transform_indices = @transform_0, window_bounds = array<i64: 256, 128>}, {pipeline_mode = #tpu.pipeline_mode<synchronous>, transform_indices = @transform_1, window_bounds = array<i64: 1, 128>}, {transform_indices = @transform_2, window_bounds = array<i64: 8, 256>}, {transform_indices = @transform_3, window_bounds = array<i64: 8, 128>}]} {
    %c0 = arith.constant 0 : index
    %c0_0 = arith.constant 0 : index
    %0 = vector.load %arg3[%c0, %c0_0] : memref<8x256xf32, #tpu.memory_space<vmem>>, vector<8x256xf32>
    %c0_1 = arith.constant 0 : index
    %c0_2 = arith.constant 0 : index
    %1 = vector.load %arg1[%c0_1, %c0_2] : memref<256x128xf32, #tpu.memory_space<vmem>>, vector<256x128xf32>
    %cst = arith.constant dense<0.000000e+00> : vector<8x128xf32>
    %2 = tpu.matmul %0, %1, %cst {dimension_numbers = #tpu.dot_dimension_numbers<[1], [0], [0], [1], [0, 0, 1, 1], [], []>, precision = #tpu.contract_precision<fp32>} : vector<8x256xf32>, vector<256x128xf32>, vector<8x128xf32> -> vector<8x128xf32>
    %c0_3 = arith.constant 0 : index
    %c0_4 = arith.constant 0 : index
    %3 = vector.load %arg2[%c0_3, %c0_4] : memref<1x128xf32, #tpu.memory_space<vmem>>, vector<1x128xf32>
    %4 = vector.broadcast %3 : vector<1x128xf32> to vector<8x128xf32>
    %5 = arith.addf %2, %4 : vector<8x128xf32>
    %c0_5 = arith.constant 0 : index
    %c0_6 = arith.constant 0 : index
    %6 = vector.load %arg4[%c0_5, %c0_6] : memref<8x128xf32, #tpu.memory_space<vmem>>, vector<8x128xf32>
    tpu.vector_store %arg4[%c0_5, %c0_6], %5 {strides = array<i32>} : memref<8x128xf32, #tpu.memory_space<vmem>>, vector<8x128xf32>,
    return
  }
  func.func @transform_0(%arg0: i32) -> (i32, i32) {
    %c0_i32 = arith.constant 0 : i32
    %c0_i32_0 = arith.constant 0 : i32
    %c0_i32_1 = arith.constant 0 : i32
    return %c0_i32, %c0_i32_0 : i32, i32
  }
  func.func @transform_1(%arg0: i32) -> (i32, i32) {
    %c0_i32 = arith.constant 0 : i32
    %c0_i32_0 = arith.constant 0 : i32
    %c0_i32_1 = arith.constant 0 : i32
    return %c0_i32, %c0_i32_0 : i32, i32
  }
  func.func @transform_2(%arg0: i32) -> (i32, i32) {
    %c0_i32 = arith.constant 0 : i32
    %c0_i32_0 = arith.constant 0 : i32
    return %arg0, %c0_i32 : i32, i32
  }
  func.func @transform_3(%arg0: i32) -> (i32, i32) {
    %c0_i32 = arith.constant 0 : i32
    %c0_i32_0 = arith.constant 0 : i32
    return %arg0, %c0_i32 : i32, i32
  }
}

</mosaic_0001>

<bundles_post_ra>
// kernel: tile.8
= control target key start
LH: loop header
LB: loop body
LE: loop exit
PB: predicated region body
PF: predicated region fallthrough
CT: control target
= control target key end

     0   :  { %s64_s0 = inlined_call_operand.vmem [shape: f32[2], index: 0, kind: input, shape index: {}]   ;;  %s65_s1 = inlined_call_operand.vmem [shape: f32[64,2], index: 1, kind: output, shape index: {}]  }
   0x1   :  { %v4_v0 = vld [vmem:[%s64_s0] ss:$0 sm:$0xff] }
   0x2   :  { %5 = vst [vmem:[%s65_s1] sm:$0xff] %v4_v0  ;;  %20 = vst [vmem:[%s65_s1 + $0x8] sm:$0xff] %v4_v0 }
   0x3   :  { %21 = vst [vmem:[%s65_s1 + $0x10] sm:$0xff] %v4_v0  ;;  %22 = vst [vmem:[%s65_s1 + $0x18] sm:$0xff] %v4_v0 }
   0x4   :  { %23 = vst [vmem:[%s65_s1 + $0x20] sm:$0xff] %v4_v0  ;;  %24 = vst [vmem:[%s65_s1 + $0x28] sm:$0xff] %v4_v0 }
   0x5   :  { %25 = vst [vmem:[%s65_s1 + $0x30] sm:$0xff] %v4_v0  ;;  %26 = vst [vmem:[%s65_s1 + $0x38] sm:$0xff] %v4_v0 }

// kernel: tile.9
= control target key start
LH: loop header
LB: loop body
LE: loop exit
PB: predicated region body
PF: predicated region fallthrough
CT: control target
= control target key end

     0   :  { %s517_s10 = smov 126   ;;  %s518_s11 = smov 122   ;;  %vm3_vm0 = vcmask 15360   ;;  %vm9_vm1 = vcmask 1048560   ;;  %vm21_vm2 = vcmask 1015760   ;;  %vm15_vm3 = vcmask 1032160   ;;  %s785_s0 = inlined_call_operand.vmem [shape: f32[64,2], index: 0, kind: input, shape index: {}]   ;;  %s786_s1 = inlined_call_operand.vmem [shape: f32[1,128], index: 1, kind: output, shape index: {}]  }
   0x1   :  { %v391_v0 = vld [vmem:[%s785_s0 + $0x3f] sm:$0x1]   ;;  %v393_v1 = vld [vmem:[%s785_s0 + $0x3d] sm:$0x1]   ;;  %v392_v2 = vld [vmem:[%s785_s0 + $0x3e] sm:$0x1]  }
   0x2   :  { %7 = vrot.lane.b32.xlu0 %v391_v0, %s517_s10  ;;  %19 = vrot.lane.b32.xlu1 %v393_v1, %s518_s11  ;;  %v394_v3 = vld [vmem:[%s785_s0 + $0x3c] sm:$0x1]   ;;  %s519_s16 = smov 124   ;;  %s520_s17 = smov 120   ;;  %v395_v4 = vld [vmem:[%s785_s0 + $0x3b] sm:$0x1]  }
   0x3   :  { %v396_v5 = vld [vmem:[%s785_s0 + $0x3a] sm:$0x1]   ;;  %s521_s22 = smov 118   ;;  %s522_s23 = smov 116   ;;  %v397_v6 = vld [vmem:[%s785_s0 + $0x39] sm:$0x1]  }
   0x4   :  { %v398_v7 = vld [vmem:[%s785_s0 + $0x38] sm:$0x1]   ;;  %s523_s28 = smov 114   ;;  %s524_s29 = smov 112   ;;  %v399_v8 = vld [vmem:[%s785_s0 + $0x37] sm:$0x1]  }
   0x5   :  { %v400_v9 = vld [vmem:[%s785_s0 + $0x36] sm:$0x1]   ;;  %s525_s5 = smov 110   ;;  %s526_s6 = smov 108   ;;  %v401_v10 = vld [vmem:[%s785_s0 + $0x35] sm:$0x1]  }
   0x6   :  { %13 = vrot.lane.b32.xlu0 %v392_v2, %s519_s16  ;;  %25 = vrot.lane.b32.xlu1 %v394_v3, %s520_s17  ;;  %v402_v11 = vld [vmem:[%s785_s0 + $0x34] sm:$0x1]   ;;  %s527_s11 = smov 106   ;;  %s528_s12 = smov 104   ;;  %v403_v12 = vld [vmem:[%s785_s0 + $0x33] sm:$0x1]  }
   0x7   :  { %v404_v13 = vld [vmem:[%s785_s0 + $0x32] sm:$0x1]   ;;  %s529_s17 = smov 102   ;;  %s530_s18 = smov 100   ;;  %v405_v14 = vld [vmem:[%s785_s0 + $0x31] sm:$0x1]  }
   0x8   :  { %v406_v15 = vld [vmem:[%s785_s0 + $0x30] sm:$0x1]   ;;  %v2_v16 = vld [vmem:[%s785_s0] sm:$0x1]   ;;  %s531_s25 = smov 98   ;;  %s532_s26 = smov 96  }
   0x9   :  { %v407_v17 = vld [vmem:[%s785_s0 + $0x2f] sm:$0x1]   ;;  %v408_v18 = vld [vmem:[%s785_s0 + $0x2e] sm:$0x1]   ;;  %4 = vst.msk [vmem:[#allocation0] sm:$0x1] %vm3_vm0, %v2_v16  }
   0xa   :  { %31 = vrot.lane.b32.xlu0 %v395_v4, %s521_s22  ;;  %37 = vrot.lane.b32.xlu1 %v396_v5, %s522_s23  ;;  %s533_s2 = smov 94   ;;  %s534_s3 = smov 92   ;;  %v409_v19 = vld [vmem:[%s785_s0 + $0x2d] sm:$0x1]   ;;  %v410_v20 = vld [vmem:[%s785_s0 + $0x2c] sm:$0x1]  }
   0xb   :  { %s535_s8 = smov 90   ;;  %s536_s9 = smov 88   ;;  %v411_v21 = vld [vmem:[%s785_s0 + $0x2b] sm:$0x1]   ;;  %v412_v22 = vld [vmem:[%s785_s0 + $0x2a] sm:$0x1]  }
   0xc   :  { %s537_s14 = smov 86   ;;  %s538_s15 = smov 84   ;;  %v413_v23 = vld [vmem:[%s785_s0 + $0x29] sm:$0x1]   ;;  %v414_v24 = vld [vmem:[%s785_s0 + $0x28] sm:$0x1]  }
   0xd   :  { %s539_s20 = smov 82   ;;  %s540_s21 = smov 80   ;;  %v415_v25 = vld [vmem:[%s785_s0 + $0x27] sm:$0x1]   ;;  %v416_v26 = vld [vmem:[%s785_s0 + $0x26] sm:$0x1]  }
   0xe   :  { %43 = vrot.lane.b32.xlu0 %v397_v6, %s523_s28  ;;  %49 = vrot.lane.b32.xlu1 %v398_v7, %s524_s29  ;;  %s542_s27 = smov 76   ;;  %v417_v27 = vld [vmem:[%s785_s0 + $0x25] sm:$0x1]   ;;  %v418_v28 = vld [vmem:[%s785_s0 + $0x24] sm:$0x1]   ;;  %s544_s4 = smov 72  }
   0xf   :  { %v419_v29 = vld [vmem:[%s785_s0 + $0x23] sm:$0x1]   ;;  %v420_v30 = vld [vmem:[%s785_s0 + $0x22] sm:$0x1]   ;;  %s546_s10 = smov 68   ;;  %s548_s16 = smov 64  }
  0x10   :  { %v421_v31 = vld [vmem:[%s785_s0 + $0x21] sm:$0x1]   ;;  %v422_v32 = vld [vmem:[%s785_s0 + $0x20] sm:$0x1]   ;;  %v423_v33 = vld [vmem:[%s785_s0 + $0x1f] sm:$0x1]  }
  0x11   :  { %v424_v34 = vld [vmem:[%s785_s0 + $0x1e] sm:$0x1]   ;;  %s550_s22 = smov 60   ;;  %v425_v35 = vld [vmem:[%s785_s0 + $0x1d] sm:$0x1]   ;;  %s552_s28 = smov 56  }
  0x12   :  { %55 = vrot.lane.b32.xlu0 %v399_v8, %s525_s5  ;;  %61 = vrot.lane.b32.xlu1 %v400_v9, %s526_s6  ;;  %v426_v36 = vld [vmem:[%s785_s0 + $0x1c] sm:$0x1]   ;;  %v427_v37 = vld [vmem:[%s785_s0 + $0x1b] sm:$0x1]   ;;  %s554_s5 = smov 52   ;;  %s560_s23 = smov 40  }
  0x13   :  { %v428_v38 = vld [vmem:[%s785_s0 + $0x1a] sm:$0x1]   ;;  %v429_v39 = vld [vmem:[%s785_s0 + $0x19] sm:$0x1]   ;;  %v430_v40 = vld [vmem:[%s785_s0 + $0x18] sm:$0x1]  }
  0x14   :  { %v431_v41 = vld [vmem:[%s785_s0 + $0x17] sm:$0x1]   ;;  %v432_v42 = vld [vmem:[%s785_s0 + $0x16] sm:$0x1]   ;;  %v433_v43 = vld [vmem:[%s785_s0 + $0x15] sm:$0x1]  }
  0x15   :  { %v434_v44 = vld [vmem:[%s785_s0 + $0x14] sm:$0x1]   ;;  %v435_v45 = vld [vmem:[%s785_s0 + $0x13] sm:$0x1]   ;;  %v436_v46 = vld [vmem:[%s785_s0 + $0x12] sm:$0x1]  }
  0x16   :  { %67 = vrot.lane.b32.xlu0 %v401_v10, %s527_s11  ;;  %73 = vrot.lane.b32.xlu1 %v402_v11, %s528_s12  ;;  %s556_s11 = smov 48   ;;  %s562_s29 = smov 36   ;;  %v437_v47 = vld [vmem:[%s785_s0 + $0x11] sm:$0x1]   ;;  %v438_v48 = vld [vmem:[%s785_s0 + $0x10] sm:$0x1]  }
  0x17   :  { %s564_s6 = smov 32   ;;  %v439_v49 = vld [vmem:[%s785_s0 + $0xf] sm:$0x1]   ;;  %v440_v50 = vld [vmem:[%s785_s0 + $0xe] sm:$0x1]   ;;  %s566_s12 = smov 28  }
  0x18   :  { %v441_v51 = vld [vmem:[%s785_s0 + $0xd] sm:$0x1]   ;;  %v442_v52 = vld [vmem:[%s785_s0 + $0xc] sm:$0x1]   ;;  %v443_v53 = vld [vmem:[%s785_s0 + $0xb] sm:$0x1]  }
  0x19   :  { %v444_v54 = vld [vmem:[%s785_s0 + $0xa] sm:$0x1]   ;;  %s570_s24 = smov 20   ;;  %v445_v55 = vld [vmem:[%s785_s0 + $0x9] sm:$0x1]   ;;  %s572_s30 = smov 16  }
  0x1a   :  { %79 = vrot.lane.b32.xlu0 %v403_v12, %s529_s17  ;;  %85 = vrot.lane.b32.xlu1 %v404_v13, %s530_s18  ;;  %s558_s17 = smov 44   ;;  %s568_s18 = smov 24   ;;  %v446_v56 = vld [vmem:[%s785_s0 + $0x8] sm:$0x1]   ;;  %v447_v57 = vld [vmem:[%s785_s0 + $0x7] sm:$0x1]  }
  0x1b   :  { %v448_v58 = vld [vmem:[%s785_s0 + $0x6] sm:$0x1]   ;;  %s574_s7 = smov 12   ;;  %v449_v59 = vld [vmem:[%s785_s0 + $0x5] sm:$0x1]   ;;  %s576_s13 = smov 8  }
  0x1c   :  { %v450_v60 = vld [vmem:[%s785_s0 + $0x4] sm:$0x1]   ;;  %v451_v63 = vld [vmem:[%s785_s0 + $0x3] sm:$0x1]   ;;  %v452_v0 = vld [vmem:[%s785_s0 + $0x2] sm:$0x1]  }
  0x1d   :  { %vm27_vm4 = vcmask 999360   ;;  %vm33_vm5 = vcmask 982960   ;;  %s578_s19 = smov 4   ;;  %v453_v3 = vld [vmem:[%s785_s0 + $0x1] sm:$0x1]   ;;  %vm39_vm6 = vcmask 966560  }
  0x1e   :  { %91 = vrot.lane.b32.xlu0 %v405_v14, %s531_s25  ;;  %97 = vrot.lane.b32.xlu1 %v406_v15, %s532_s26  ;;  %s541_s26 = smov 78   ;;  %s579_s0 = smov 2   ;;  %vm45_vm7 = vcmask 950160   ;;  %vm51_vm8 = vcmask 933760   ;;  %vm57_vm9 = vcmask 917360   ;;  %vm63_vm10 = vcmask 900960  }
  0x1f   :  { %vm69_vm11 = vcmask 884560   ;;  %vm75_vm12 = vcmask 868160   ;;  %vm81_vm13 = vcmask 851760   ;;  %vm87_vm14 = vcmask 835360  }
  0x20   :  { %vm93_vm15 = vcmask 818960   ;;  %vm99_vm0 = vcmask 802560  }
  0x22   :  { %103 = vrot.lane.b32.xlu0 %v407_v17, %s533_s2  ;;  %109 = vrot.lane.b32.xlu1 %v408_v18, %s534_s3  ;;  %s543_s3 = smov 74  }
  0x26   :  { %115 = vrot.lane.b32.xlu0 %v409_v19, %s535_s8  ;;  %121 = vrot.lane.b32.xlu1 %v410_v20, %s536_s9  ;;  %s545_s9 = smov 70  }
  0x2a   :  { %127 = vrot.lane.b32.xlu0 %v411_v21, %s537_s14  ;;  %133 = vrot.lane.b32.xlu1 %v412_v22, %s538_s15  ;;  %s547_s15 = smov 66  }
  0x2e   :  { %139 = vrot.lane.b32.xlu0 %v413_v23, %s539_s20  ;;  %145 = vrot.lane.b32.xlu1 %v414_v24, %s540_s21  ;;  %s549_s21 = smov 62  }
  0x32   :  { %151 = vrot.lane.b32.xlu0 %v415_v25, %s541_s26  ;;  %157 = vrot.lane.b32.xlu1 %v416_v26, %s542_s27  ;;  %s551_s27 = smov 58  }
  0x36   :  { %163 = vrot.lane.b32.xlu0 %v417_v27, %s543_s3  ;;  %169 = vrot.lane.b32.xlu1 %v418_v28, %s544_s4  ;;  %s553_s4 = smov 54  }
  0x3a   :  { %175 = vrot.lane.b32.xlu0 %v419_v29, %s545_s9  ;;  %181 = vrot.lane.b32.xlu1 %v420_v30, %s546_s10  ;;  %s555_s10 = smov 50  }
  0x3e   :  { %187 = vrot.lane.b32.xlu0 %v421_v31, %s547_s15  ;;  %193 = vrot.lane.b32.xlu1 %v422_v32, %s548_s16  ;;  %s557_s16 = smov 46  }
  0x42   :  { %199 = vrot.lane.b32.xlu0 %v423_v33, %s549_s21  ;;  %205 = vrot.lane.b32.xlu1 %v424_v34, %s550_s22  ;;  %s559_s22 = smov 42  }
  0x46   :  { %211 = vrot.lane.b32.xlu0 %v425_v35, %s551_s27  ;;  %217 = vrot.lane.b32.xlu1 %v426_v36, %s552_s28  ;;  %s561_s28 = smov 38  }
  0x4a   :  { %223 = vrot.lane.b32.xlu0 %v427_v37, %s553_s4  ;;  %229 = vrot.lane.b32.xlu1 %v428_v38, %s554_s5  ;;  %s563_s5 = smov 34  }
  0x4e   :  { %235 = vrot.lane.b32.xlu0 %v429_v39, %s555_s10  ;;  %241 = vrot.lane.b32.xlu1 %v430_v40, %s556_s11  ;;  %s565_s11 = smov 30  }
  0x52   :  { %247 = vrot.lane.b32.xlu0 %v431_v41, %s557_s16  ;;  %253 = vrot.lane.b32.xlu1 %v432_v42, %s558_s17  ;;  %s567_s17 = smov 26  }
  0x56   :  { %259 = vrot.lane.b32.xlu0 %v433_v43, %s559_s22  ;;  %265 = vrot.lane.b32.xlu1 %v434_v44, %s560_s23  ;;  %s569_s23 = smov 22  }
  0x5a   :  { %271 = vrot.lane.b32.xlu0 %v435_v45, %s561_s28  ;;  %277 = vrot.lane.b32.xlu1 %v436_v46, %s562_s29  ;;  %s571_s29 = smov 18  }
  0x5e   :  { %283 = vrot.lane.b32.xlu0 %v437_v47, %s563_s5  ;;  %289 = vrot.lane.b32.xlu1 %v438_v48, %s564_s6  ;;  %s573_s6 = smov 14  }
  0x62   :  { %295 = vrot.lane.b32.xlu0 %v439_v49, %s565_s11  ;;  %301 = vrot.lane.b32.xlu1 %v440_v50, %s566_s12  ;;  %s575_s12 = smov 10  }
  0x66   :  { %307 = vrot.lane.b32.xlu0 %v441_v51, %s567_s17  ;;  %313 = vrot.lane.b32.xlu1 %v442_v52, %s568_s18  ;;  %s577_s18 = smov 6  }
  0x6a   :  { %319 = vrot.lane.b32.xlu0 %v443_v53, %s569_s23  ;;  %325 = vrot.lane.b32.xlu1 %v444_v54, %s570_s24 }
  0x6e   :  { %331 = vrot.lane.b32.xlu0 %v445_v55, %s571_s29  ;;  %337 = vrot.lane.b32.xlu1 %v446_v56, %s572_s30 }
  0x72   :  { %343 = vrot.lane.b32.xlu0 %v447_v57, %s573_s6  ;;  %349 = vrot.lane.b32.xlu1 %v448_v58, %s574_s7 }
  0x74   :  { %v8_v61 = vpop.permute.xlu0 %7   ;;  %v20_v62 = vpop.permute.xlu1 %19  }
  0x75   :  { %10 = vst.msk [vmem:[#allocation0] sm:$0x1] %vm9_vm1, %v8_v61   ;;  %vm105_vm1 = vcmask 786160  }
  0x76   :  { %355 = vrot.lane.b32.xlu0 %v449_v59, %s575_s12  ;;  %361 = vrot.lane.b32.xlu1 %v450_v60, %s576_s13 }
  0x78   :  { %v14_v1 = vpop.permute.xlu0 %13   ;;  %v26_v2 = vpop.permute.xlu1 %25  }
  0x79   :  { %16 = vst.msk [vmem:[#allocation0] sm:$0x1] %vm15_vm3, %v14_v1   ;;  %vm117_vm3 = vcmask 753360  }
  0x7a   :  { %22 = vst.msk [vmem:[#allocation0] sm:$0x1] %vm21_vm2, %v20_v62   ;;  %367 = vrot.lane.b32.xlu0 %v451_v63, %s577_s18  ;;  %373 = vrot.lane.b32.xlu1 %v452_v0, %s578_s19  ;;  %vm111_vm2 = vcmask 769760  }
  0x7b   :  { %28 = vst.msk [vmem:[#allocation0] sm:$0x1] %vm27_vm4, %v26_v2   ;;  %vm123_vm4 = vcmask 736960  }
  0x7c   :  { %v32_v4 = vpop.permute.xlu0 %31   ;;  %v38_v5 = vpop.permute.xlu1 %37  }
  0x7d   :  { %34 = vst.msk [vmem:[#allocation0] sm:$0x1] %vm33_vm5, %v32_v4   ;;  %vm129_vm5 = vcmask 720560  }
  0x7e   :  { %379 = vrot.lane.b32.xlu0 %v453_v3, %s579_s0  ;;  %40 = vst.msk [vmem:[#allocation0] sm:$0x1] %vm39_vm6, %v38_v5   ;;  %vm135_vm6 = vcmask 704160  }
  0x80   :  { %v44_v6 = vpop.permute.xlu0 %43   ;;  %v50_v7 = vpop.permute.xlu1 %49  }
  0x81   :  { %46 = vst.msk [vmem:[#allocation0] sm:$0x1] %vm45_vm7, %v44_v6   ;;  %vm141_vm7 = vcmask 687760  }
  0x82   :  { %52 = vst.msk [vmem:[#allocation0] sm:$0x1] %vm51_vm8, %v50_v7   ;;  %vm147_vm8 = vcmask 671360  }
  0x84   :  { %v56_v8 = vpop.permute.xlu0 %55   ;;  %v62_v9 = vpop.permute.xlu1 %61  }
  0x85   :  { %58 = vst.msk [vmem:[#allocation0] sm:$0x1] %vm57_vm9, %v56_v8   ;;  %vm153_vm9 = vcmask 654960  }
  0x86   :  { %64 = vst.msk [vmem:[#allocation0] sm:$0x1] %vm63_vm10, %v62_v9   ;;  %vm159_vm10 = vcmask 638560  }
  0x88   :  { %v68_v10 = vpop.permute.xlu0 %67   ;;  %v74_v11 = vpop.permute.xlu1 %73  }
  0x89   :  { %70 = vst.msk [vmem:[#allocation0] sm:$0x1] %vm69_vm11, %v68_v10   ;;  %vm165_vm11 = vcmask 622160  }
  0x8a   :  { %76 = vst.msk [vmem:[#allocation0] sm:$0x1] %vm75_vm12, %v74_v11   ;;  %vm171_vm12 = vcmask 605760  }
  0x8c   :  { %v80_v12 = vpop.permute.xlu0 %79   ;;  %v86_v13 = vpop.permute.xlu1 %85  }
  0x8d   :  { %82 = vst.msk [vmem:[#allocation0] sm:$0x1] %vm81_vm13, %v80_v12   ;;  %vm177_vm13 = vcmask 589360  }
  0x8e   :  { %88 = vst.msk [vmem:[#allocation0] sm:$0x1] %vm87_vm14, %v86_v13   ;;  %vm183_vm14 = vcmask 572960  }
  0x90   :  { %v92_v14 = vpop.permute.xlu0 %91   ;;  %v98_v15 = vpop.permute.xlu1 %97  }
  0x91   :  { %94 = vst.msk [vmem:[#allocation0] sm:$0x1] %vm93_vm15, %v92_v14   ;;  %vm189_vm15 = vcmask 556560  }
  0x92   :  { %100 = vst.msk [vmem:[#allocation0] sm:$0x1] %vm99_vm0, %v98_v15   ;;  %vm195_vm0 = vcmask 540160  }
  0x94   :  { %v104_v16 = vpop.permute.xlu0 %103   ;;  %v110_v17 = vpop.permute.xlu1 %109  }
  0x95   :  { %106 = vst.msk [vmem:[#allocation0] sm:$0x1] %vm105_vm1, %v104_v16   ;;  %vm201_vm1 = vcmask 523760  }
  0x96   :  { %112 = vst.msk [vmem:[#allocation0] sm:$0x1] %vm111_vm2, %v110_v17   ;;  %vm207_vm2 = vcmask 507360  }
  0x98   :  { %v116_v18 = vpop.permute.xlu0 %115   ;;  %v122_v19 = vpop.permute.xlu1 %121  }
  0x99   :  { %118 = vst.msk [vmem:[#allocation0] sm:$0x1] %vm117_vm3, %v116_v18   ;;  %vm213_vm3 = vcmask 490960  }
  0x9a   :  { %124 = vst.msk [vmem:[#allocation0] sm:$0x1] %vm123_vm4, %v122_v19   ;;  %vm219_vm4 = vcmask 474560  }
  0x9c   :  { %v128_v20 = vpop.permute.xlu0 %127   ;;  %v134_v21 = vpop.permute.xlu1 %133  }
  0x9d   :  { %130 = vst.msk [vmem:[#allocation0] sm:$0x1] %vm129_vm5, %v128_v20   ;;  %vm225_vm5 = vcmask 458160  }
  0x9e   :  { %136 = vst.msk [vmem:[#allocation0] sm:$0x1] %vm135_vm6, %v134_v21   ;;  %vm231_vm6 = vcmask 441760  }
  0xa0   :  { %v140_v22 = vpop.permute.xlu0 %139   ;;  %v146_v23 = vpop.permute.xlu1 %145  }
  0xa1   :  { %142 = vst.msk [vmem:[#allocation0] sm:$0x1] %vm141_vm7, %v140_v22   ;;  %vm237_vm7 = vcmask 425360  }
  0xa2   :  { %148 = vst.msk [vmem:[#allocation0] sm:$0x1] %vm147_vm8, %v146_v23   ;;  %vm243_vm8 = vcmask 408960  }
  0xa4   :  { %v152_v24 = vpop.permute.xlu0 %151   ;;  %v158_v25 = vpop.permute.xlu1 %157  }
  0xa5   :  { %154 = vst.msk [vmem:[#allocation0] sm:$0x1] %vm153_vm9, %v152_v24   ;;  %vm249_vm9 = vcmask 392560  }
  0xa6   :  { %160 = vst.msk [vmem:[#allocation0] sm:$0x1] %vm159_vm10, %v158_v25   ;;  %vm255_vm10 = vcmask 376160  }
  0xa8   :  { %v164_v26 = vpop.permute.xlu0 %163   ;;  %v170_v27 = vpop.permute.xlu1 %169  }
  0xa9   :  { %166 = vst.msk [vmem:[#allocation0] sm:$0x1] %vm165_vm11, %v164_v26   ;;  %vm261_vm11 = vcmask 359760  }
  0xaa   :  { %172 = vst.msk [vmem:[#allocation0] sm:$0x1] %vm171_vm12, %v170_v27   ;;  %vm267_vm12 = vcmask 343360  }
  0xac   :  { %v176_v28 = vpop.permute.xlu0 %175   ;;  %v182_v29 = vpop.permute.xlu1 %181  }
  0xad   :  { %178 = vst.msk [vmem:[#allocation0] sm:$0x1] %vm177_vm13, %v176_v28   ;;  %vm273_vm13 = vcmask 326960  }
  0xae   :  { %184 = vst.msk [vmem:[#allocation0] sm:$0x1] %vm183_vm14, %v182_v29   ;;  %vm279_vm14 = vcmask 310560  }
  0xb0   :  { %v188_v30 = vpop.permute.xlu0 %187   ;;  %v194_v31 = vpop.permute.xlu1 %193  }
  0xb1   :  { %190 = vst.msk [vmem:[#allocation0] sm:$0x1] %vm189_vm15, %v188_v30   ;;  %vm285_vm15 = vcmask 294160  }
  0xb2   :  { %196 = vst.msk [vmem:[#allocation0] sm:$0x1] %vm195_vm0, %v194_v31   ;;  %vm291_vm0 = vcmask 277760  }
  0xb4   :  { %v200_v32 = vpop.permute.xlu0 %199   ;;  %v206_v33 = vpop.permute.xlu1 %205  }
  0xb5   :  { %202 = vst.msk [vmem:[#allocation0] sm:$0x1] %vm201_vm1, %v200_v32   ;;  %vm297_vm1 = vcmask 261360  }
  0xb6   :  { %208 = vst.msk [vmem:[#allocation0] sm:$0x1] %vm207_vm2, %v206_v33   ;;  %vm303_vm2 = vcmask 244960  }
  0xb8   :  { %v212_v34 = vpop.permute.xlu0 %211   ;;  %v218_v35 = vpop.permute.xlu1 %217  }
  0xb9   :  { %214 = vst.msk [vmem:[#allocation0] sm:$0x1] %vm213_vm3, %v212_v34   ;;  %vm309_vm3 = vcmask 228560  }
  0xba   :  { %220 = vst.msk [vmem:[#allocation0] sm:$0x1] %vm219_vm4, %v218_v35   ;;  %vm315_vm4 = vcmask 212160  }
  0xbc   :  { %v224_v36 = vpop.permute.xlu0 %223   ;;  %v230_v37 = vpop.permute.xlu1 %229  }
  0xbd   :  { %226 = vst.msk [vmem:[#allocation0] sm:$0x1] %vm225_vm5, %v224_v36   ;;  %vm321_vm5 = vcmask 195760  }
  0xbe   :  { %232 = vst.msk [vmem:[#allocation0] sm:$0x1] %vm231_vm6, %v230_v37   ;;  %vm327_vm6 = vcmask 179360  }
  0xc0   :  { %v236_v38 = vpop.permute.xlu0 %235   ;;  %v242_v39 = vpop.permute.xlu1 %241  }
  0xc1   :  { %238 = vst.msk [vmem:[#allocation0] sm:$0x1] %vm237_vm7, %v236_v38   ;;  %vm333_vm7 = vcmask 162960  }
  0xc2   :  { %244 = vst.msk [vmem:[#allocation0] sm:$0x1] %vm243_vm8, %v242_v39   ;;  %vm339_vm8 = vcmask 146560  }
  0xc4   :  { %v248_v40 = vpop.permute.xlu0 %247   ;;  %v254_v41 = vpop.permute.xlu1 %253  }
  0xc5   :  { %250 = vst.msk [vmem:[#allocation0] sm:$0x1] %vm249_vm9, %v248_v40   ;;  %vm345_vm9 = vcmask 130160  }
  0xc6   :  { %256 = vst.msk [vmem:[#allocation0] sm:$0x1] %vm255_vm10, %v254_v41   ;;  %vm351_vm10 = vcmask 113760  }
  0xc8   :  { %v260_v42 = vpop.permute.xlu0 %259   ;;  %v266_v43 = vpop.permute.xlu1 %265  }
  0xc9   :  { %262 = vst.msk [vmem:[#allocation0] sm:$0x1] %vm261_vm11, %v260_v42   ;;  %vm357_vm11 = vcmask 97360  }
  0xca   :  { %268 = vst.msk [vmem:[#allocation0] sm:$0x1] %vm267_vm12, %v266_v43   ;;  %vm363_vm12 = vcmask 80960  }
  0xcc   :  { %v272_v44 = vpop.permute.xlu0 %271   ;;  %v278_v45 = vpop.permute.xlu1 %277  }
  0xcd   :  { %274 = vst.msk [vmem:[#allocation0] sm:$0x1] %vm273_vm13, %v272_v44   ;;  %vm369_vm13 = vcmask 64560  }
  0xce   :  { %280 = vst.msk [vmem:[#allocation0] sm:$0x1] %vm279_vm14, %v278_v45   ;;  %vm375_vm14 = vcmask 48160  }
  0xd0   :  { %v284_v46 = vpop.permute.xlu0 %283   ;;  %v290_v47 = vpop.permute.xlu1 %289  }
  0xd1   :  { %286 = vst.msk [vmem:[#allocation0] sm:$0x1] %vm285_vm15, %v284_v46   ;;  %vm381_vm15 = vcmask 31760  }
  0xd2   :  { %292 = vst.msk [vmem:[#allocation0] sm:$0x1] %vm291_vm0, %v290_v47  }
  0xd4   :  { %v296_v48 = vpop.permute.xlu0 %295   ;;  %v302_v49 = vpop.permute.xlu1 %301  }
  0xd5   :  { %298 = vst.msk [vmem:[#allocation0] sm:$0x1] %vm297_vm1, %v296_v48  }
  0xd6   :  { %304 = vst.msk [vmem:[#allocation0] sm:$0x1] %vm303_vm2, %v302_v49  }
  0xd8   :  { %v308_v50 = vpop.permute.xlu0 %307   ;;  %v314_v51 = vpop.permute.xlu1 %313  }
  0xd9   :  { %310 = vst.msk [vmem:[#allocation0] sm:$0x1] %vm309_vm3, %v308_v50  }
  0xda   :  { %316 = vst.msk [vmem:[#allocation0] sm:$0x1] %vm315_vm4, %v314_v51  }
  0xdc   :  { %v320_v52 = vpop.permute.xlu0 %319   ;;  %v326_v53 = vpop.permute.xlu1 %325  }
  0xdd   :  { %322 = vst.msk [vmem:[#allocation0] sm:$0x1] %vm321_vm5, %v320_v52  }
  0xde   :  { %328 = vst.msk [vmem:[#allocation0] sm:$0x1] %vm327_vm6, %v326_v53  }
  0xe0   :  { %v332_v54 = vpop.permute.xlu0 %331   ;;  %v338_v55 = vpop.permute.xlu1 %337  }
  0xe1   :  { %334 = vst.msk [vmem:[#allocation0] sm:$0x1] %vm333_vm7, %v332_v54  }
  0xe2   :  { %340 = vst.msk [vmem:[#allocation0] sm:$0x1] %vm339_vm8, %v338_v55  }
  0xe4   :  { %v344_v56 = vpop.permute.xlu0 %343   ;;  %v350_v57 = vpop.permute.xlu1 %349  }
  0xe5   :  { %346 = vst.msk [vmem:[#allocation0] sm:$0x1] %vm345_vm9, %v344_v56  }
  0xe6   :  { %352 = vst.msk [vmem:[#allocation0] sm:$0x1] %vm351_vm10, %v350_v57  }
  0xe8   :  { %v356_v58 = vpop.permute.xlu0 %355   ;;  %v362_v59 = vpop.permute.xlu1 %361  }
  0xe9   :  { %358 = vst.msk [vmem:[#allocation0] sm:$0x1] %vm357_vm11, %v356_v58  }
  0xea   :  { %364 = vst.msk [vmem:[#allocation0] sm:$0x1] %vm363_vm12, %v362_v59  }
  0xec   :  { %v368_v60 = vpop.permute.xlu0 %367   ;;  %v374_v61 = vpop.permute.xlu1 %373  }
  0xed   :  { %370 = vst.msk [vmem:[#allocation0] sm:$0x1] %vm369_vm13, %v368_v60  }
  0xee   :  { %376 = vst.msk [vmem:[#allocation0] sm:$0x1] %vm375_vm14, %v374_v61  }
  0xf0   :  { %v380_v62 = vpop.permute.xlu0 %379  }
  0xf1   :  { %382 = vst.msk [vmem:[#allocation0] sm:$0x1] %vm381_vm15, %v380_v62  }
  0xf8   :  { %v387_v63 = vld [vmem:[#allocation0] sm:$0x1] }
  0xf9   :  { %390 = vst [vmem:[%s786_s1] sm:$0x1] %v387_v63 }

// kernel: myblock_forward.1
= control target key start
LH: loop header
LB: loop body
LE: loop exit
PB: predicated region body
PF: predicated region fallthrough
CT: control target
= control target key end

     0   :  { %s1863_s0 = inlined_call_operand.vmem [shape: f32[256,128], index: 0, kind: input, shape index: {}]   ;;  %s1864_s2 = inlined_call_operand.vmem [shape: f32[8,256], index: 2, kind: input, shape index: {}]   ;;  %s1865_s1 = inlined_call_operand.vmem [shape: f32[1,128], index: 1, kind: input, shape index: {}]   ;;  %s1866_s3 = inlined_call_operand.vmem [shape: f32[8,128], index: 3, kind: output, shape index: {}]  }
   0x1   :  { %v47_v0 = vld [vmem:[%s1863_s0 + $0xf8] sm:$0xff]  ;;  %v46_v2 = vld [vmem:[%s1863_s0 + $0xf0] sm:$0xff]  ;;  %v45_v7 = vld [vmem:[%s1863_s0 + $0xe8] sm:$0xff] }
   0x2   :  { %v31_v1 = vld [vmem:[%s1863_s0 + $0x78] sm:$0xff]  ;;  %v1162_v3 = vand.u32 4294901760, %v47_v0  ;;  %v1166_v5 = vand.u32 4294901760, %v46_v2  ;;  %v30_v6 = vld [vmem:[%s1863_s0 + $0x70] sm:$0xff]  ;;  %v29_v8 = vld [vmem:[%s1863_s0 + $0x68] sm:$0xff]  ;;  %v1179_v10 = vand.u32 4294901760, %v45_v7 }
   0x3   :  { %v1164_v4 = vand.u32 4294901760, %v31_v1  ;;  %v1177_v9 = vand.u32 4294901760, %v30_v6  ;;  %v1181_v11 = vand.u32 4294901760, %v29_v8  ;;  %v44_v12 = vld [vmem:[%s1863_s0 + $0xe0] sm:$0xff]  ;;  %v43_v14 = vld [vmem:[%s1863_s0 + $0xd8] sm:$0xff]  ;;  %v1210_v20 = vld [vmem:[%s1863_s0 + $0xd0] sm:$0xff] }
   0x4   :  { %v28_v13 = vld [vmem:[%s1863_s0 + $0x60] sm:$0xff]  ;;  %923 = vmatprep.subr.mxu0 %v1162_v3  ;;  %v1193_v15 = vand.u32 4294901760, %v44_v12  ;;  %v1197_v17 = vand.u32 4294901760, %v43_v14  ;;  %v1200_v18 = vsub.f32 %v47_v0, %v1162_v3  ;;  %v1205_v19 = vld [vmem:[%s1863_s0 + $0x58] sm:$0xff]  ;;  %v1215_v21 = vld [vmem:[%s1863_s0 + $0x50] sm:$0xff]  ;;  %v1225_v24 = vand.u32 4294901760, %v1210_v20 }
   0x5   :  { %v1195_v16 = vand.u32 4294901760, %v28_v13  ;;  %924 = vmatpush3.msra.mxu0 %v1164_v4  ;;  %v1219_v22 = vand.u32 4294901760, %v1205_v19  ;;  %v1222_v23 = vsub.f32 %v31_v1, %v1164_v4  ;;  %v1228_v25 = vsub.f32 %v46_v2, %v1166_v5  ;;  %v1233_v26 = vld [vmem:[%s1863_s0 + $0xc8] sm:$0xff]  ;;  %v1243_v28 = vld [vmem:[%s1863_s0 + $0xc0] sm:$0xff]  ;;  %v1295_v46 = vld [vmem:[%s1863_s0 + $0xb8] sm:$0xff] }
   0x6   :  { %v1238_v27 = vld [vmem:[%s1863_s0 + $0x48] sm:$0xff]  ;;  %925 = vmatprep.subr.mxu0 %v1166_v5  ;;  %v1880_v29 = vand.u32 4294901760, %v1200_v18  ;;  %v1248_v30 = vand.u32 4294901760, %v1215_v21  ;;  %v1251_v31 = vsub.f32 %v30_v6, %v1177_v9  ;;  %v1254_v32 = vand.u32 4294901760, %v1233_v26  ;;  %v1268_v37 = vld [vmem:[%s1863_s0 + $0x40] sm:$0xff]  ;;  %v1308_v51 = vld [vmem:[%s1863_s0 + $0x38] sm:$0xff] }
   0x7   :  { %926 = vmatpush3.msra.mxu0 %v1177_v9  ;;  %v1879_v33 = vand.u32 4294901760, %v1222_v23  ;;  %v1877_v34 = vand.u32 4294901760, %v1228_v25  ;;  %v1260_v35 = vsub.f32 %v45_v7, %v1179_v10  ;;  %v1263_v36 = vand.u32 4294901760, %v1238_v27  ;;  %v1318_v56 = vld [vmem:[%s1863_s0 + $0xb0] sm:$0xff]  ;;  %v1348_v2 = vld [vmem:[%s1863_s0 + $0xa8] sm:$0xff] }
   0x8   :  { %1936 = vst [vmem:[#allocation2_spill] sm:$0xff] %v1248_v30  ;;  %1937 = vst [vmem:[#allocation3_spill] sm:$0xff] %v1254_v32  ;;  %927 = vmatprep.subr.mxu0 %v1179_v10  ;;  %v283_v38 = vsub.f32 %v1200_v18, %v1880_v29  ;;  %v1876_v39 = vand.u32 4294901760, %v1251_v31  ;;  %v1276_v40 = vsub.f32 %v29_v8, %v1181_v11  ;;  %v1279_v41 = vand.u32 4294901760, %v1243_v28  ;;  %v1333_v61 = vld [vmem:[%s1863_s0 + $0x30] sm:$0xff] }
   0x9   :  { %1938 = vst [vmem:[#allocation4_spill] sm:$0xff] %v1263_v36  ;;  %928 = vmatpush3.msra.mxu0 %v1181_v11  ;;  %v171_v42 = vsub.f32 %v1222_v23, %v1879_v33  ;;  %v290_v43 = vsub.f32 %v1228_v25, %v1877_v34  ;;  %v1874_v44 = vand.u32 4294901760, %v1260_v35  ;;  %v1290_v45 = vsub.f32 %v44_v12, %v1193_v15  ;;  %v1484_v33 = vld [vmem:[%s1863_s0 + $0x88] sm:$0xff] }
   0xa   :  { %1939 = vst [vmem:[#allocation5_spill] sm:$0xff] %v1279_v41  ;;  %929 = vmatprep.subr.mxu0 %v1193_v15  ;;  %v284_v47 = vand.u32 4294901760, %v283_v38  ;;  %v178_v48 = vsub.f32 %v1251_v31, %v1876_v39  ;;  %v1872_v49 = vand.u32 4294901760, %v1276_v40  ;;  %v1303_v50 = vand.u32 4294901760, %v1268_v37 }
   0xb   :  { %930 = vmatpush3.msra.mxu0 %v1195_v16  ;;  %v172_v52 = vand.u32 4294901760, %v171_v42  ;;  %v291_v53 = vand.u32 4294901760, %v290_v43  ;;  %v297_v54 = vsub.f32 %v1260_v35, %v1874_v44  ;;  %v1871_v55 = vand.u32 4294901760, %v1290_v45  ;;  %v1457_v44 = vld [vmem:[%s1863_s0 + $0x90] sm:$0xff] }
   0xc   :  { %1940 = vst [vmem:[#allocation6_spill] sm:$0xff] %v1303_v50  ;;  %931 = vmatprep.subr.mxu0 %v1197_v17  ;;  %958 = vmatprep.subr.mxu1 %v284_v47  ;;  %v179_v57 = vand.u32 4294901760, %v178_v48  ;;  %v185_v58 = vsub.f32 %v1276_v40, %v1872_v49  ;;  %v1325_v59 = vsub.f32 %v28_v13, %v1195_v16  ;;  %v1328_v60 = vand.u32 4294901760, %v1295_v46  ;;  %v1362_v13 = vld [vmem:[%s1863_s0 + $0x28] sm:$0xff]  ;;  %v1441_v49 = vld [vmem:[%s1863_s0 + $0x18] sm:$0xff] }
   0xd   :  { %932 = vmatpush3.msra.mxu0 %v1219_v22  ;;  %959 = vmatpush3.msra.mxu1 %v172_v52  ;;  %v298_v62 = vand.u32 4294901760, %v297_v54  ;;  %v304_v63 = vsub.f32 %v1290_v45, %v1871_v55  ;;  %v1340_v0 = vsub.f32 %v43_v14, %v1197_v17  ;;  %v1343_v1 = vand.u32 4294901760, %v1308_v51 }
   0xe   :  { %1941 = vst [vmem:[#allocation7_spill] sm:$0xff] %v1328_v60  ;;  %933 = vmatprep.subr.mxu0 %v1225_v24  ;;  %960 = vmatprep.subr.mxu1 %v291_v53  ;;  %v186_v6 = vand.u32 4294901760, %v185_v58  ;;  %v1869_v7 = vand.u32 4294901760, %v1325_v59  ;;  %v1354_v8 = vsub.f32 %v1205_v19, %v1219_v22  ;;  %v1357_v12 = vand.u32 4294901760, %v1318_v56 }
   0xf   :  { %1942 = vst [vmem:[#allocation8_spill] sm:$0xff] %v1343_v1  ;;  %934 = vmatpush3.msra.mxu0 %v1248_v30  ;;  %961 = vmatpush3.msra.mxu1 %v179_v57  ;;  %v305_v14 = vand.u32 4294901760, %v304_v63  ;;  %v1867_v38 = vand.u32 4294901760, %v1340_v0  ;;  %v1368_v42 = vsub.f32 %v1210_v20, %v1225_v24  ;;  %v1371_v19 = vand.u32 4294901760, %v1333_v61  ;;  %v1388_v20 = vld [vmem:[%s1863_s0 + $0xa0] sm:$0xff] }
  0x10   :  { %1943 = vst [vmem:[#allocation9_spill] sm:$0xff] %v1357_v12  ;;  %935 = vmatprep.subr.mxu0 %v1254_v32  ;;  %962 = vmatprep.subr.mxu1 %v298_v62  ;;  %v192_v43 = vsub.f32 %v1325_v59, %v1869_v7  ;;  %v1868_v47 = vand.u32 4294901760, %v1354_v8  ;;  %v1380_v48 = vsub.f32 %v1215_v21, %v1248_v30  ;;  %v1383_v52 = vand.u32 4294901760, %v1348_v2 }
  0x11   :  { %1944 = vst [vmem:[#allocation10_spill] sm:$0xff] %v1371_v19  ;;  %936 = vmatpush3.msra.mxu0 %v1263_v36  ;;  %963 = vmatpush3.msra.mxu1 %v186_v6  ;;  %v311_v53 = vsub.f32 %v1340_v0, %v1867_v38  ;;  %v1870_v54 = vand.u32 4294901760, %v1368_v42  ;;  %v1397_v21 = vsub.f32 %v1233_v26, %v1254_v32  ;;  %v1400_v57 = vand.u32 4294901760, %v1362_v13  ;;  %v1414_v26 = vld [vmem:[%s1863_s0 + $0x20] sm:$0xff] }
  0x12   :  { %1945 = vst [vmem:[#allocation11_spill] sm:$0xff] %v1383_v52  ;;  %937 = vmatprep.subr.mxu0 %v1279_v41  ;;  %964 = vmatprep.subr.mxu1 %v305_v14  ;;  %v193_v58 = vand.u32 4294901760, %v192_v43  ;;  %v199_v62 = vsub.f32 %v1354_v8, %v1868_v47  ;;  %v1873_v63 = vand.u32 4294901760, %v1380_v48  ;;  %v1409_v6 = vsub.f32 %v1238_v27, %v1263_v36  ;;  %v1427_v27 = vld [vmem:[%s1863_s0 + $0x98] sm:$0xff] }
  0x13   :  { %1946 = vst [vmem:[#allocation12_spill] sm:$0xff] %v1400_v57  ;;  %938 = vmatpush3.msra.mxu0 %v1303_v50  ;;  %v312_v38 = vand.u32 4294901760, %v311_v53  ;;  %v318_v14 = vsub.f32 %v1368_v42, %v1870_v54  ;;  %v1875_v43 = vand.u32 4294901760, %v1397_v21  ;;  %v1422_v47 = vand.u32 4294901760, %v1388_v20 }
  0x14   :  { %965 = vmatpush3.msra.mxu1 %v193_v58  ;;  %939 = vmatprep.subr.mxu0 %v1328_v60  ;;  %v200_v7 = vand.u32 4294901760, %v199_v62  ;;  %v206_v53 = vsub.f32 %v1380_v48, %v1873_v63  ;;  %v1878_v54 = vand.u32 4294901760, %v1409_v6  ;;  %v1436_v55 = vsub.f32 %v1243_v28, %v1279_v41  ;;  %v14_v41 = vld [vmem:[%s1864_s2] sm:$0xff] }
  0x15   :  { %1947 = vst [vmem:[#allocation13_spill] sm:$0xff] %v1422_v47  ;;  %966 = vmatprep.subr.mxu1 %v312_v38  ;;  %940 = vmatpush3.msra.mxu0 %v1343_v1  ;;  %v319_v58 = vand.u32 4294901760, %v318_v14  ;;  %v325_v62 = vsub.f32 %v1397_v21, %v1875_v43  ;;  %v1448_v63 = vand.u32 4294901760, %v1414_v26  ;;  %v1452_v28 = vsub.f32 %v1268_v37, %v1303_v50  ;;  %v1470_v37 = vld [vmem:[%s1863_s0 + $0x10] sm:$0xff] }
  0x16   :  { %967 = vmatpush3.msra.mxu1 %v200_v7  ;;  %941 = vmatprep.subr.mxu0 %v1357_v12  ;;  %v207_v38 = vand.u32 4294901760, %v206_v53  ;;  %v213_v14 = vsub.f32 %v1409_v6, %v1878_v54  ;;  %v1883_v43 = vand.u32 4294901760, %v1436_v55  ;;  %v1465_v39 = vand.u32 4294901760, %v1427_v27 }
  0x17   :  { %1948 = vst [vmem:[#allocation14_spill] sm:$0xff] %v1448_v63  ;;  %968 = vmatprep.subr.mxu1 %v319_v58  ;;  %942 = vmatpush3.msra.mxu0 %v1371_v19  ;;  %v326_v7 = vand.u32 4294901760, %v325_v62  ;;  %v1884_v53 = vand.u32 4294901760, %v1452_v28  ;;  %v1476_v34 = vsub.f32 %v1295_v46, %v1328_v60  ;;  %v1479_v54 = vand.u32 4294901760, %v1441_v49 }
  0x18   :  { %969 = vmatpush3.msra.mxu1 %v207_v38  ;;  %943 = vmatprep.subr.mxu0 %v1383_v52  ;;  %v214_v58 = vand.u32 4294901760, %v213_v14  ;;  %v332_v62 = vsub.f32 %v1436_v55, %v1883_v43  ;;  %v1492_v46 = vsub.f32 %v1308_v51, %v1343_v1  ;;  %v1495_v29 = vand.u32 4294901760, %v1457_v44  ;;  %v1512_v51 = vld [vmem:[%s1863_s0 + $0x8] sm:$0xff] }
  0x19   :  { %1949 = vst [vmem:[#allocation15_spill] sm:$0xff] %v1479_v54  ;;  %970 = vmatprep.subr.mxu1 %v326_v7  ;;  %944 = vmatpush3.msra.mxu0 %v1400_v57  ;;  %v220_v38 = vsub.f32 %v1452_v28, %v1884_v53  ;;  %v1504_v60 = vsub.f32 %v1318_v56, %v1357_v12  ;;  %v1507_v43 = vand.u32 4294901760, %v1470_v37  ;;  %v1521_v56 = vand.u32 4294901760, %v1484_v33  ;;  %v1526_v12 = vld [vmem:[%s1863_s0 + $0x80] sm:$0xff] }
  0x1a   :  { %1950 = vst [vmem:[#allocation16_spill] sm:$0xff] %v1495_v29  ;;  %971 = vmatpush3.msra.mxu1 %v214_v58  ;;  %945 = vmatprep.subr.mxu0 %v1422_v47  ;;  %v333_v7 = vand.u32 4294901760, %v332_v62  ;;  %v1518_v14 = vsub.f32 %v1333_v61, %v1371_v19  ;;  %v1954_v1 = vand.u32 4294901760, %v1476_v34  ;;  %v1535_v61 = vsub.f32 %v1348_v2, %v1383_v52  ;;  %v1552_v2 = vld [vmem:[%s1863_s0] sm:$0xff] }
  0x1b   :  { %1951 = vst [vmem:[#allocation17_spill] sm:$0xff] %v1507_v43  ;;  %1953 = vst [vmem:[#allocation19_spill] sm:$0xff] %v1521_v56  ;;  %946 = vmatpush3.msra.mxu0 %v1448_v63  ;;  %v221_v58 = vand.u32 4294901760, %v220_v38  ;;  %v1901_v53 = vand.u32 4294901760, %v1504_v60  ;;  %v1956_v19 = vand.u32 4294901760, %v1492_v46  ;;  %v1543_v38 = vand.u32 4294901760, %v1512_v51 }
  0x1c   :  { %1952 = vst [vmem:[#allocation18_spill] sm:$0xff] %v1518_v14  ;;  %v339_v62 = vsub.f32 %v1476_v34, %v1954_v1  ;;  %1955 = vst [vmem:[#allocation20_spill] sm:$0xff] %v1535_v61  ;;  %972 = vmatprep.subr.mxu1 %v333_v7  ;;  %947 = vmatprep.subr.mxu0 %v1465_v39  ;;  %v1547_v1 = vsub.f32 %v1362_v13, %v1400_v57  ;;  %v1560_v52 = vand.u32 4294901760, %v1526_v12  ;;  %v15_v13 = vld [vmem:[%s1864_s2 + $0x8] sm:$0xff] }
  0x1d   :  { %v227_v50 = vsub.f32 %v1492_v46, %v1956_v19  ;;  %973 = vmatpush3.msra.mxu1 %v221_v58  ;;  %948 = vmatpush3.msra.mxu0 %v1479_v54  ;;  %v346_v19 = vsub.f32 %v1504_v60, %v1901_v53  ;;  %v1957_v58 = vand.u32 4294901760, %v1518_v14  ;;  %v1572_v53 = vsub.f32 %v1388_v20, %v1422_v47 }
  0x1e   :  { %v340_v7 = vand.u32 4294901760, %v339_v62  ;;  %949 = vmatprep.subr.mxu0 %v1495_v29  ;;  %v1586_v36 = vsub.f32 %v1414_v26, %v1448_v63  ;;  %v1597_v26 = vand.u32 4294901760, %v14_v41 }
  0x1f   :  { %v228_v57 = vand.u32 4294901760, %v227_v50  ;;  %v234_v62 = vsub.f32 %v1518_v14, %v1957_v58  ;;  %v347_v32 = vand.u32 4294901760, %v346_v19  ;;  %950 = vmatpush3.msra.mxu0 %v1507_v43  ;;  %v1958_v50 = vand.u32 4294901760, %v1535_v61 }
  0x20   :  { %974 = vmatprep.subr.mxu1 %v340_v7  ;;  %v1582_v58 = vand.u32 4294901760, %v1552_v2  ;;  %951 = vmatprep.subr.mxu0 %v1521_v56  ;;  %v1959_v7 = vand.u32 4294901760, %v1547_v1  ;;  %v1912_v47 = vand.u32 4294901760, %v1572_v53  ;;  %v1593_v14 = vand.u32 4294901760, %v15_v13  ;;  %1961 = vst [vmem:[#allocation22_spill] sm:$0xff] %v1597_v26 }
  0x21   :  { %v353_v30 = vsub.f32 %v1535_v61, %v1958_v50  ;;  %975 = vmatpush3.msra.mxu1 %v228_v57  ;;  %v235_v20 = vand.u32 4294901760, %v234_v62  ;;  %952 = vmatpush3.msra.mxu0 %v1543_v38  ;;  %v1913_v61 = vand.u32 4294901760, %v1586_v36  ;;  %v1601_v57 = vsub.f32 %v1427_v27, %v1465_v39 }
  0x22   :  { %v241_v19 = vsub.f32 %v1547_v1, %v1959_v7  ;;  %1960 = vst [vmem:[#allocation21_spill] sm:$0xff] %v1593_v14  ;;  %976 = vmatprep.subr.mxu1 %v347_v32  ;;  %953 = vmatprep.subr.mxu0 %v1560_v52  ;;  %v360_v7 = vsub.f32 %v1572_v53, %v1912_v47 }
  0x23   :  { %v354_v50 = vand.u32 4294901760, %v353_v30  ;;  %977 = vmatpush3.msra.mxu1 %v235_v20  ;;  %v1608_v30 = vsub.f32 %v15_v13, %v1593_v14  ;;  %v1612_v32 = vsub.f32 %v1441_v49, %v1479_v54  ;;  %954 = vmatpush3.msra.mxu0 %v1582_v58  ;;  %v248_v27 = vsub.f32 %v1586_v36, %v1913_v61 }
  0x24   :  { %v242_v62 = vand.u32 4294901760, %v241_v19  ;;  %v1620_v19 = vsub.f32 %v14_v41, %v1597_v26  ;;  %v1624_v13 = vsub.f32 %v1457_v44, %v1495_v29  ;;  %v361_v47 = vand.u32 4294901760, %v360_v7  ;;  %993 = vmatprep.subr.mxu0 %v1200_v18  ;;  %392 = vmatprep.mubr.f32.mxu1 %v1593_v14 }
  0x25   :  { %978 = vmatprep.subr.mxu1 %v354_v50  ;;  %v1918_v49 = vand.u32 4294901760, %v1608_v30  ;;  %v1921_v50 = vand.u32 4294901760, %v1612_v32  ;;  %v1631_v61 = vsub.f32 %v1470_v37, %v1507_v43  ;;  %v249_v20 = vand.u32 4294901760, %v248_v27 }
  0x26   :  { %979 = vmatpush3.msra.mxu1 %v242_v62  ;;  %v1962_v41 = vand.u32 4294901760, %v1601_v57  ;;  %v1963_v62 = vand.u32 4294901760, %v1620_v19  ;;  %v1964_v14 = vand.u32 4294901760, %v1624_v13  ;;  %v1658_v43 = vsub.f32 %v1512_v51, %v1543_v38 }
  0x27   :  { %980 = vmatprep.subr.mxu1 %v361_v47  ;;  %v154_v7 = vsub.f32 %v1608_v30, %v1918_v49  ;;  %v255_v37 = vsub.f32 %v1612_v32, %v1921_v50  ;;  %v1966_v29 = vand.u32 4294901760, %v1631_v61 }
  0x28   :  { %v367_v54 = vsub.f32 %v1601_v57, %v1962_v41  ;;  %v1648_v41 = vsub.f32 %v1484_v33, %v1521_v56  ;;  %981 = vmatpush3.msra.mxu1 %v249_v20  ;;  %v160_v47 = vsub.f32 %v1620_v19, %v1963_v62  ;;  %v374_v49 = vsub.f32 %v1624_v13, %v1964_v14 }
  0x29   :  { %1965 = vst [vmem:[#allocation23_spill] sm:$0xff] %v1658_v43  ;;  %v155_v50 = vand.u32 4294901760, %v154_v7  ;;  %v256_v27 = vand.u32 4294901760, %v255_v37  ;;  %v262_v33 = vsub.f32 %v1631_v61, %v1966_v29  ;;  %v1928_v62 = vand.u32 4294901760, %v1658_v43 }
  0x2a   :  { %v368_v44 = vand.u32 4294901760, %v367_v54  ;;  %v1929_v54 = vand.u32 4294901760, %v1648_v41  ;;  %v161_v20 = vand.u32 4294901760, %v160_v47  ;;  %v375_v56 = vand.u32 4294901760, %v374_v49 }
  0x2b   :  { %v1667_v14 = vsub.f32 %v1526_v12, %v1560_v52  ;;  %156 = vmatprep.mubr.f32.mxu0 %v155_v50  ;;  %v263_v51 = vand.u32 4294901760, %v262_v33  ;;  %v1674_v29 = vsub.f32 %v1552_v2, %v1582_v58  ;;  %v269_v49 = vsub.f32 %v1658_v43, %v1928_v62  ;;  %v1969_v33 = vld [vmem:[#allocation18_spill] sm:$0xff]  ;;  %v1982_v62 = vld [vmem:[#allocation13_spill] sm:$0xff] }
  0x2c   :  { %982 = vmatprep.subr.mxu1 %v368_v44  ;;  %v381_v7 = vsub.f32 %v1648_v41, %v1929_v54  ;;  %162 = vmatmul.mubr.f32.vlgmr.msra.gmra.mxu0 %v161_v20  ;;  %v1970_v20 = vld [vmem:[#allocation2_spill] sm:$0xff]  ;;  %v1983_v54 = vand.u32 4294901760, %v1200_v18  ;;  %v1991_v18 = vand.u32 4294901760, %v1260_v35 }
  0x2d   :  { %1967 = vst [vmem:[#allocation24_spill] sm:$0xff] %v1667_v14  ;;  %983 = vmatpush3.msra.mxu1 %v256_v27  ;;  %1968 = vst [vmem:[#allocation25_spill] sm:$0xff] %v1674_v29  ;;  %v1927_v12 = vand.u32 4294901760, %v1667_v14  ;;  %994 = vmatpush3.msra.mxu0 %v1222_v23  ;;  %v1926_v44 = vand.u32 4294901760, %v1674_v29  ;;  %v270_v37 = vand.u32 4294901760, %v269_v49  ;;  %v1973_v49 = vld [vmem:[#allocation4_spill] sm:$0xff] }
  0x2e   :  { %984 = vmatprep.subr.mxu1 %v375_v56  ;;  %v382_v50 = vand.u32 4294901760, %v381_v7  ;;  %995 = vmatprep.subr.mxu0 %v1228_v25  ;;  %v1972_v7 = vld [vmem:[#allocation3_spill] sm:$0xff] }
  0x2f   :  { %985 = vmatpush3.msra.mxu1 %v263_v51  ;;  %v388_v2 = vsub.f32 %v1667_v14, %v1927_v12  ;;  %529 = vmatprep.mubr.f32.mxu0 %v1608_v30  ;;  %v276_v56 = vsub.f32 %v1674_v29, %v1926_v44  ;;  %v1971_v51 = vld [vmem:[#allocation20_spill] sm:$0xff]  ;;  %v1980_v44 = vld [vmem:[#allocation11_spill] sm:$0xff] }
  0x30   :  { %996 = vmatpush3.msra.mxu0 %v1251_v31  ;;  %986 = vmatprep.subr.mxu1 %v382_v50  ;;  %v1974_v50 = vld [vmem:[#allocation5_spill] sm:$0xff]  ;;  %v1981_v12 = vld [vmem:[#allocation12_spill] sm:$0xff] }
  0x31   :  { %997 = vmatprep.subr.mxu0 %v1260_v35  ;;  %987 = vmatpush3.msra.mxu1 %v270_v37  ;;  %v389_v27 = vand.u32 4294901760, %v388_v2  ;;  %v277_v47 = vand.u32 4294901760, %v276_v56  ;;  %v1975_v37 = vld [vmem:[#allocation6_spill] sm:$0xff]  ;;  %v1976_v2 = vld [vmem:[#allocation7_spill] sm:$0xff]  ;;  %v1977_v56 = vld [vmem:[#allocation8_spill] sm:$0xff]  ;;  %v1996_v35 = vand.u32 4294901760, %v1620_v19 }
  0x32   :  { %998 = vmatpush3.msra.mxu0 %v1276_v40 }
  0x33   :  { %988 = vmatprep.subr.mxu1 %v389_v27  ;;  %999 = vmatprep.subr.mxu0 %v1290_v45  ;;  %v1978_v27 = vld [vmem:[#allocation9_spill] sm:$0xff] }
  0x34   :  { %989 = vmatpush3.msra.mxu1 %v277_v47  ;;  %1000 = vmatpush3.msra.mxu0 %v1325_v59  ;;  %v1979_v47 = vld [vmem:[#allocation10_spill] sm:$0xff] }
  0x35   :  { %394 = vmatmul.mubr.f32.vlgmr.msra.gmra.mxu1 %v1597_v26  ;;  %1001 = vmatprep.subr.mxu0 %v1340_v0  ;;  %v1984_v26 = vld [vmem:[#allocation15_spill] sm:$0xff] }
  0x36   :  { %1028 = vmatprep.subr.mxu1 %v1162_v3  ;;  %1002 = vmatpush3.msra.mxu0 %v1354_v8 }
  0x37   :  { %1029 = vmatpush3.msra.mxu1 %v1164_v4  ;;  %1003 = vmatprep.subr.mxu0 %v1368_v42 }
  0x38   :  { %1030 = vmatprep.subr.mxu1 %v1166_v5  ;;  %1004 = vmatpush3.msra.mxu0 %v1380_v48 }
  0x39   :  { %1031 = vmatpush3.msra.mxu1 %v1177_v9  ;;  %1005 = vmatprep.subr.mxu0 %v1397_v21 }
  0x3a   :  { %1032 = vmatprep.subr.mxu1 %v1179_v10  ;;  %1006 = vmatpush3.msra.mxu0 %v1409_v6 }
  0x3b   :  { %1033 = vmatpush3.msra.mxu1 %v1181_v11  ;;  %1007 = vmatprep.subr.mxu0 %v1436_v55 }
  0x3c   :  { %1034 = vmatprep.subr.mxu1 %v1193_v15  ;;  %1008 = vmatpush3.msra.mxu0 %v1452_v28 }
  0x3d   :  { %1035 = vmatpush3.msra.mxu1 %v1195_v16  ;;  %1009 = vmatprep.subr.mxu0 %v1476_v34 }
  0x3e   :  { %1036 = vmatprep.subr.mxu1 %v1197_v17  ;;  %1010 = vmatpush3.msra.mxu0 %v1492_v46 }
  0x3f   :  { %1037 = vmatpush3.msra.mxu1 %v1219_v22  ;;  %1011 = vmatprep.subr.mxu0 %v1504_v60 }
  0x40   :  { %1038 = vmatprep.subr.mxu1 %v1225_v24  ;;  %1012 = vmatpush3.msra.mxu0 %v1969_v33 }
  0x41   :  { %1039 = vmatpush3.msra.mxu1 %v1970_v20  ;;  %1013 = vmatprep.subr.mxu0 %v1971_v51 }
  0x42   :  { %1040 = vmatprep.subr.mxu1 %v1972_v7  ;;  %1014 = vmatpush3.msra.mxu0 %v1547_v1 }
  0x43   :  { %1041 = vmatpush3.msra.mxu1 %v1973_v49  ;;  %1015 = vmatprep.subr.mxu0 %v1572_v53 }
  0x44   :  { %1042 = vmatprep.subr.mxu1 %v1974_v50  ;;  %1016 = vmatpush3.msra.mxu0 %v1586_v36 }
  0x45   :  { %1043 = vmatpush3.msra.mxu1 %v1975_v37  ;;  %1017 = vmatprep.subr.mxu0 %v1601_v57 }
  0x46   :  { %1044 = vmatprep.subr.mxu1 %v1976_v2  ;;  %1018 = vmatpush3.msra.mxu0 %v1612_v32 }
  0x47   :  { %1045 = vmatpush3.msra.mxu1 %v1977_v56  ;;  %1019 = vmatprep.subr.mxu0 %v1624_v13 }
  0x48   :  { %1046 = vmatprep.subr.mxu1 %v1978_v27  ;;  %1020 = vmatpush3.msra.mxu0 %v1631_v61 }
  0x49   :  { %1047 = vmatpush3.msra.mxu1 %v1979_v47  ;;  %1021 = vmatprep.subr.mxu0 %v1648_v41 }
  0x4a   :  { %1048 = vmatprep.subr.mxu1 %v1980_v44  ;;  %1022 = vmatpush3.msra.mxu0 %v1658_v43  ;;  %v1985_v43 = vand.u32 4294901760, %v1222_v23  ;;  %v1992_v23 = vand.u32 4294901760, %v1276_v40  ;;  %v1998_v40 = vand.u32 4294901760, %v1354_v8  ;;  %v2017_v8 = vand.u32 4294901760, %v1648_v41 }
  0x4b   :  { %1049 = vmatpush3.msra.mxu1 %v1981_v12  ;;  %1023 = vmatprep.subr.mxu0 %v1667_v14  ;;  %v1986_v12 = vld [vmem:[#allocation16_spill] sm:$0xff]  ;;  %v1990_v14 = vld [vmem:[#allocation19_spill] sm:$0xff] }
  0x4c   :  { %1050 = vmatprep.subr.mxu1 %v1982_v62  ;;  %1024 = vmatpush3.msra.mxu0 %v1674_v29  ;;  %v1987_v62 = vand.u32 4294901760, %v1228_v25  ;;  %v1988_v29 = vld [vmem:[#allocation17_spill] sm:$0xff]  ;;  %v1993_v25 = vand.u32 4294901760, %v1290_v45  ;;  %v1999_v45 = vand.u32 4294901760, %v1368_v42  ;;  %v2018_v42 = vld [vmem:[#allocation23_spill] sm:$0xff] }
  0x4d   :  { %1051 = vmatpush3.msra.mxu1 %v1448_v63  ;;  %532 = vmatmul.mubr.f32.vlgmr.msra.gmra.mxu0 %v1620_v19  ;;  %v1989_v63 = vand.u32 4294901760, %v1251_v31  ;;  %v1994_v31 = vand.u32 4294901760, %v1608_v30  ;;  %v2028_v30 = vld [vmem:[#allocation22_spill] sm:$0xff] }
  0x4e   :  { %1052 = vmatprep.subr.mxu1 %v1465_v39  ;;  %1063 = vmatprep.subr.mxu0 %v1983_v54  ;;  %v922_v54 = vld [vmem:[%s1865_s1] ss:$0 sm:$0xff] }
  0x4f   :  { %1053 = vmatpush3.msra.mxu1 %v1984_v26  ;;  %1064 = vmatpush3.msra.mxu0 %v1985_v43  ;;  %v1997_v43 = vand.u32 4294901760, %v1340_v0  ;;  %v2001_v0 = vand.u32 4294901760, %v1397_v21  ;;  %v2020_v21 = vld [vmem:[#allocation12_spill] sm:$0xff] }
  0x50   :  { %1054 = vmatprep.subr.mxu1 %v1986_v12  ;;  %1065 = vmatprep.subr.mxu0 %v1987_v62 }
  0x51   :  { %1055 = vmatpush3.msra.mxu1 %v1988_v29  ;;  %1066 = vmatpush3.msra.mxu0 %v1989_v63  ;;  %v1995_v63 = vand.u32 4294901760, %v1325_v59  ;;  %v2000_v59 = vand.u32 4294901760, %v1380_v48  ;;  %v2019_v48 = vand.u32 4294901760, %v2018_v42 }
  0x52   :  { %1056 = vmatprep.subr.mxu1 %v1990_v14  ;;  %1067 = vmatprep.subr.mxu0 %v1991_v18 }
  0x53   :  { %1057 = vmatpush3.msra.mxu1 %v1543_v38  ;;  %1068 = vmatpush3.msra.mxu0 %v1992_v23 }
  0x54   :  { %1058 = vmatprep.subr.mxu1 %v1560_v52  ;;  %1069 = vmatprep.subr.mxu0 %v1993_v25 }
  0x55   :  { %1059 = vmatpush3.msra.mxu1 %v1582_v58  ;;  %636 = vmatprep.mubr.f32.mxu1 %v1994_v31 }
  0x56   :  { %1070 = vmatpush3.msra.mxu0 %v1995_v63  ;;  %640 = vmatmul.mubr.f32.vlgmr.msra.gmra.mxu1 %v1996_v35 }
  0x57   :  { %1071 = vmatprep.subr.mxu0 %v1997_v43  ;;  %1098 = vmatprep.subr.mxu1 %v1162_v3  ;;  %v2002_v3 = vand.u32 4294901760, %v1409_v6  ;;  %v2021_v6 = vld [vmem:[#allocation24_spill] sm:$0xff] }
  0x58   :  { %1072 = vmatpush3.msra.mxu0 %v1998_v40  ;;  %1099 = vmatpush3.msra.mxu1 %v1164_v4  ;;  %v2003_v4 = vand.u32 4294901760, %v1436_v55  ;;  %v2014_v55 = vand.u32 4294901760, %v1612_v32 }
  0x59   :  { %1073 = vmatprep.subr.mxu0 %v1999_v45  ;;  %1100 = vmatprep.subr.mxu1 %v1166_v5  ;;  %v2004_v5 = vand.u32 4294901760, %v1452_v28  ;;  %v2022_v28 = vand.u32 4294901760, %v2021_v6 }
  0x5a   :  { %1074 = vmatpush3.msra.mxu0 %v2000_v59  ;;  %1101 = vmatpush3.msra.mxu1 %v1177_v9  ;;  %v2005_v9 = vand.u32 4294901760, %v1476_v34  ;;  %v2013_v34 = vand.u32 4294901760, %v1601_v57  ;;  %v2027_v57 = vld [vmem:[#allocation14_spill] sm:$0xff] }
  0x5b   :  { %1075 = vmatprep.subr.mxu0 %v2001_v0  ;;  %1102 = vmatprep.subr.mxu1 %v1179_v10  ;;  %v2006_v10 = vand.u32 4294901760, %v1492_v46  ;;  %v2024_v46 = vld [vmem:[#allocation25_spill] sm:$0xff] }
  0x5c   :  { %1076 = vmatpush3.msra.mxu0 %v2002_v3  ;;  %1103 = vmatpush3.msra.mxu1 %v1181_v11  ;;  %v2007_v11 = vand.u32 4294901760, %v1504_v60  ;;  %v2015_v60 = vand.u32 4294901760, %v1624_v13 }
  0x5d   :  { %1077 = vmatprep.subr.mxu0 %v2003_v4  ;;  %1104 = vmatprep.subr.mxu1 %v1193_v15  ;;  %v2008_v15 = vand.u32 4294901760, %v1969_v33 }
  0x5e   :  { %1078 = vmatpush3.msra.mxu0 %v2004_v5  ;;  %1105 = vmatpush3.msra.mxu1 %v1195_v16  ;;  %v2009_v16 = vand.u32 4294901760, %v1971_v51 }
  0x5f   :  { %1079 = vmatprep.subr.mxu0 %v2005_v9  ;;  %1106 = vmatprep.subr.mxu1 %v1197_v17  ;;  %v2010_v17 = vand.u32 4294901760, %v1547_v1  ;;  %v2026_v1 = vld [vmem:[#allocation21_spill] sm:$0xff] }
  0x60   :  { %1080 = vmatpush3.msra.mxu0 %v2006_v10  ;;  %1107 = vmatpush3.msra.mxu1 %v1219_v22  ;;  %v2011_v22 = vand.u32 4294901760, %v1572_v53  ;;  %v2023_v53 = vld [vmem:[#allocation13_spill] sm:$0xff] }
  0x61   :  { %1081 = vmatprep.subr.mxu0 %v2007_v11  ;;  %1108 = vmatprep.subr.mxu1 %v1225_v24  ;;  %v2012_v24 = vand.u32 4294901760, %v1586_v36  ;;  %v2016_v36 = vand.u32 4294901760, %v1631_v61  ;;  %v2025_v61 = vand.u32 4294901760, %v2024_v46 }
  0x62   :  { %1082 = vmatpush3.msra.mxu0 %v2008_v15  ;;  %1109 = vmatpush3.msra.mxu1 %v1970_v20 }
  0x63   :  { %1083 = vmatprep.subr.mxu0 %v2009_v16  ;;  %1110 = vmatprep.subr.mxu1 %v1972_v7 }
  0x64   :  { %1084 = vmatpush3.msra.mxu0 %v2010_v17  ;;  %1111 = vmatpush3.msra.mxu1 %v1973_v49 }
  0x65   :  { %1085 = vmatprep.subr.mxu0 %v2011_v22  ;;  %1112 = vmatprep.subr.mxu1 %v1974_v50 }
  0x66   :  { %1086 = vmatpush3.msra.mxu0 %v2012_v24  ;;  %1113 = vmatpush3.msra.mxu1 %v1975_v37 }
  0x67   :  { %1087 = vmatprep.subr.mxu0 %v2013_v34  ;;  %1114 = vmatprep.subr.mxu1 %v1976_v2 }
  0x68   :  { %1088 = vmatpush3.msra.mxu0 %v2014_v55  ;;  %1115 = vmatpush3.msra.mxu1 %v1977_v56 }
  0x69   :  { %1089 = vmatprep.subr.mxu0 %v2015_v60  ;;  %1116 = vmatprep.subr.mxu1 %v1978_v27 }
  0x6a   :  { %1090 = vmatpush3.msra.mxu0 %v2016_v36  ;;  %1117 = vmatpush3.msra.mxu1 %v1979_v47 }
  0x6b   :  { %1091 = vmatprep.subr.mxu0 %v2017_v8  ;;  %1118 = vmatprep.subr.mxu1 %v1980_v44 }
  0x6c   :  { %1092 = vmatpush3.msra.mxu0 %v2019_v48  ;;  %1119 = vmatpush3.msra.mxu1 %v2020_v21 }
  0x6d   :  { %1093 = vmatprep.subr.mxu0 %v2022_v28  ;;  %1120 = vmatprep.subr.mxu1 %v2023_v53 }
  0x6e   :  { %1094 = vmatpush3.msra.mxu0 %v2025_v61  ;;  %806 = vmatprep.mubr.f32.mxu0 %v2026_v1 }
  0x6f   :  { %1121 = vmatpush3.msra.mxu1 %v2027_v57  ;;  %808 = vmatmul.mubr.f32.vlgmr.msra.gmra.mxu0 %v2028_v30 }
  0x70   :  { %1122 = vmatprep.subr.mxu1 %v1465_v39  ;;  %910 = vmatprep.mubr.f32.mxu1 %v2026_v1 }
  0x71   :  { %1123 = vmatpush3.msra.mxu1 %v1984_v26 }
  0x72   :  { %1124 = vmatprep.subr.mxu1 %v1986_v12 }
  0x73   :  { %1125 = vmatpush3.msra.mxu1 %v1988_v29 }
  0x74   :  { %1126 = vmatprep.subr.mxu1 %v1990_v14 }
  0x75   :  { %1127 = vmatpush3.msra.mxu1 %v1543_v38 }
  0x76   :  { %1128 = vmatprep.subr.mxu1 %v1560_v52 }
  0x77   :  { %1129 = vmatpush3.msra.mxu1 %v1582_v58 }
  0x78   :  { %912 = vmatmul.mubr.f32.vlgmr.msra.gmra.mxu1 %v2028_v30 }
  0xec   :  { %v955_v32 = vpop.f32.mrf.mxu0 }
  0xee   :  { %v956_v39 = vpop.f32.mrf.mxu0 }
  0xef   :  { %v957_v26 = vadd.f32 %v956_v39, %v955_v32 }
  0xf1   :  { %v164_v38 = vadd.f32 %v957_v26, %v922_v54 }
  0xf5   :  { %v990_v19 = vpop.f32.mrf.mxu1 }
  0xf7   :  { %v991_v41 = vpop.f32.mrf.mxu1 }
  0xf8   :  { %v992_v12 = vadd.f32 %v991_v41, %v990_v19 }
  0xfa   :  { %v396_v33 = vadd.f32 %v992_v12, %v164_v38 }
 0x10d   :  { %v1025_v13 = vpop.f32.mrf.mxu0 }
 0x10f   :  { %v1026_v62 = vpop.f32.mrf.mxu0 }
 0x110   :  { %v1027_v44 = vadd.f32 %v1026_v62, %v1025_v13 }
 0x112   :  { %v534_v51 = vadd.f32 %v1027_v44, %v396_v33 }
 0x116   :  { %v1060_v14 = vpop.f32.mrf.mxu1 }
 0x118   :  { %v1061_v52 = vpop.f32.mrf.mxu1 }
 0x119   :  { %v1062_v20 = vadd.f32 %v1061_v52, %v1060_v14 }
 0x11b   :  { %v642_v50 = vadd.f32 %v1062_v20, %v534_v51 }
 0x12f   :  { %v1095_v29 = vpop.f32.mrf.mxu0 }
 0x131   :  { %v1096_v58 = vpop.f32.mrf.mxu0 }
 0x132   :  { %v1097_v7 = vadd.f32 %v1096_v58, %v1095_v29 }
 0x134   :  { %v810_v2 = vadd.f32 %v1097_v7, %v642_v50 }
 0x138   :  { %v1130_v49 = vpop.f32.mrf.mxu1 }
 0x13a   :  { %v1131_v37 = vpop.f32.mrf.mxu1 }
 0x13b   :  { %v1132_v56 = vadd.f32 %v1131_v37, %v1130_v49 }
 0x13d   :  { %v914_v27 = vadd.f32 %v1132_v56, %v810_v2 }
 0x13f   :  { %917 = vst [vmem:[%s1866_s3] sm:$0xff] %v914_v27 }

</bundles_post_ra>
